<compile_context>
chip_gen: v5e
topology: v5e:2x2
jax: 0.10.0
libtpu: 0.0.40
codegen_flags: <defaults>
</compile_context>

<pallas_src>
import functools

import jax
import jax.numpy as jnp
from jax.experimental import pallas as pl
from jax.experimental.pallas import tpu as pltpu


def _cross_attn_kernel(
    xq_ref, xkv_ref,
    qg_ref, qb_ref, kvg_ref, kvb_ref,
    wq_ref, bq_ref, wk_ref, bk_ref, wv_ref, bv_ref,
    wo_ref, bo_ref,
    o_ref,
    *, num_heads, matmul_dtype,
):
    eps = 1e-5

    xq = xq_ref[...]     # (N, Dq)   -- one batch element per grid step
    xkv = xkv_ref[...]   # (L, Dkv)

    def layer_norm(x, gamma, beta):
        mu = jnp.mean(x, axis=-1, keepdims=True)
        var = jnp.mean((x - mu) ** 2, axis=-1, keepdims=True)
        return (x - mu) * jax.lax.rsqrt(var + eps) * gamma + beta

    xq_n = layer_norm(xq, qg_ref[...], qb_ref[...]).astype(matmul_dtype)
    xkv_n = layer_norm(xkv, kvg_ref[...], kvb_ref[...]).astype(matmul_dtype)

    n_q = xq.shape[0]
    d_out = o_ref.shape[-1]
    acc = jnp.zeros((n_q, d_out), jnp.float32)

    # Contract last dim of lhs with last dim of rhs == q @ k^T without an
    # explicit transpose (the MXU handles the orientation).
    dn_t = (((1,), (1,)), ((), ()))

    # Static head loop (H is small & static).  All slicing happens on the
    # leading dim of the head-major WEIGHT refs -- no lane slicing, no stack,
    # no activation transpose.
    for h in range(num_heads):
        # dp_scale already folded into wq/bq on the host.
        q_h = jnp.dot(xq_n, wq_ref[h],
                      preferred_element_type=jnp.float32) + bq_ref[h]    # (N, cqk)
        k_h = jnp.dot(xkv_n, wk_ref[h],
                      preferred_element_type=jnp.float32) + bk_ref[h]    # (L, cqk)
        v_h = jnp.dot(xkv_n, wv_ref[h],
                      preferred_element_type=jnp.float32) + bv_ref[h]    # (L, cv)

        s = jax.lax.dot_general(q_h.astype(matmul_dtype),
                                k_h.astype(matmul_dtype),
                                dn_t, preferred_element_type=jnp.float32)  # (N, L)

        s_max = jnp.max(s, axis=-1, keepdims=True)
        e = jnp.exp(s - s_max)
        denom = jnp.sum(e, axis=-1, keepdims=True)
        p = e * pl.reciprocal(denom, approx=True)     # EUP slot, not VPU divide

        o_h = jnp.dot(p.astype(matmul_dtype), v_h.astype(matmul_dtype),
                      preferred_element_type=jnp.float32)                 # (N, cv)

        # concat_h(o_h) @ Wo == sum_h o_h @ Wo[h]  (no lane-concatenate).
        acc = acc + jnp.dot(o_h.astype(matmul_dtype), wo_ref[h],
                            preferred_element_type=jnp.float32)           # (N, Dout)

    o_ref[...] = (acc + bo_ref[...]).astype(o_ref.dtype)


def _default_dimension_semantics():
    """Device-aware batch-axis semantics.

    v7x has 2 TensorCores per chip -> shard the batch grid axis across them.
    v5e / v6e are single-TC -> the grid is a plain sequential loop and
    "arbitrary" is fine (parallel vs arbitrary has near-zero codegen impact).
    """
    try:
        kind = jax.devices()[0].device_kind.lower()
    except Exception:
        kind = ""
    if "v7" in kind:
        return (pltpu.CORE_PARALLEL,)
    return ("arbitrary",)


def cross_attention_pallas(x_q, x_kv, params, *, num_heads,
                           use_bf16_matmul=False, dimension_semantics=None,
                           pad_mask=None, rot_pos_emb_q=None,
                           rot_pos_emb_k=None, kv_cache=None,
                           causal_attention=False):
    # TODO(synk): pad_mask / causal / rotary / kv_cache paths not implemented.
    assert pad_mask is None and rot_pos_emb_q is None and rot_pos_emb_k is None, \
        "masking / rotary paths are not implemented in the Pallas kernel"
    assert kv_cache is None and not causal_attention, \
        "kv_cache / causal attention are not implemented in the Pallas kernel"

    B, N, Dq = x_q.shape
    Bk, L, Dkv = x_kv.shape
    assert Bk == B
    Dqk = params["wq_t"].shape[1]
    Dv = params["wv_t"].shape[1]
    Dout = params["wo_t"].shape[1]
    H = num_heads
    assert Dqk % H == 0 and Dv % H == 0
    cqk = Dqk // H
    cv = Dv // H

    # ---- host-side constant folds / head-major weight packing (free) ----
    dp_scale = cqk ** (-0.5)
    w_dtype = jnp.bfloat16 if use_bf16_matmul else jnp.float32
    wq3 = (params["wq_t"] * dp_scale).reshape(Dq, H, cqk).transpose(1, 0, 2).astype(w_dtype)
    bq3 = (params["bq"] * dp_scale).reshape(1, H, cqk).transpose(1, 0, 2)
    wk3 = params["wk_t"].reshape(Dkv, H, cqk).transpose(1, 0, 2).astype(w_dtype)
    bk3 = params["bk"].reshape(1, H, cqk).transpose(1, 0, 2)
    wv3 = params["wv_t"].reshape(Dkv, H, cv).transpose(1, 0, 2).astype(w_dtype)
    bv3 = params["bv"].reshape(1, H, cv).transpose(1, 0, 2)
    wo3 = params["wo_t"].reshape(H, cv, Dout).astype(w_dtype)
    bo = params["bo"]

    # Fold batch into the row (sublane) dimension; the grid picks one batch
    # element's rows per step via the BlockSpec (sublane addressing, cheap).
    xq2 = x_q.reshape(B * N, Dq)
    xkv2 = x_kv.reshape(B * L, Dkv)

    kernel = functools.partial(_cross_attn_kernel,
                               num_heads=H, matmul_dtype=w_dtype)

    def full_spec(shape):
        nd = len(shape)
        return pl.BlockSpec(shape, lambda b, nd=nd: (0,) * nd)

    grid_spec = pltpu.PrefetchScalarGridSpec(
        num_scalar_prefetch=0,
        grid=(B,),                                      # one batch element / step
        in_specs=[
            pl.BlockSpec((N, Dq), lambda b: (b, 0)),    # x_q rows of batch b
            pl.BlockSpec((L, Dkv), lambda b: (b, 0)),   # x_kv rows of batch b
            full_spec((1, Dq)),            # q_norm gamma
            full_spec((1, Dq)),            # q_norm beta
            full_spec((1, Dkv)),           # kv_norm gamma
            full_spec((1, Dkv)),           # kv_norm beta
            full_spec((H, Dq, cqk)),       # Wq head-major (dp_scale folded)
            full_spec((H, 1, cqk)),        # bq head-major (dp_scale folded)
            full_spec((H, Dkv, cqk)),      # Wk head-major
            full_spec((H, 1, cqk)),        # bk head-major
            full_spec((H, Dkv, cv)),       # Wv head-major
            full_spec((H, 1, cv)),         # bv head-major
            full_spec((H, cv, Dout)),      # Wo per head
            full_spec((1, Dout)),          # bo
        ],
        out_specs=pl.BlockSpec((N, Dout), lambda b: (b, 0)),
    )

    if dimension_semantics is None:
        dimension_semantics = _default_dimension_semantics()

    out2 = pl.pallas_call(
        kernel,
        out_shape=jax.ShapeDtypeStruct((B * N, Dout), jnp.float32),
        grid_spec=grid_spec,
        compiler_params=pltpu.CompilerParams(
            dimension_semantics=dimension_semantics,
            vmem_limit_bytes=32 * 1024 * 1024,
        ),
    )(
        xq2, xkv2,
        params["q_gamma"], params["q_beta"],
        params["kv_gamma"], params["kv_beta"],
        wq3, bq3, wk3, bk3, wv3, bv3, wo3, bo,
    )
    return out2.reshape(B, N, Dout)


def cross_attention_reference(x_q, x_kv, params, *, num_heads):
    """Pure-JAX reference mirroring the PyTorch forward."""
    eps = 1e-5

    def layer_norm(x, g, b):
        mu = jnp.mean(x, axis=-1, keepdims=True)
        var = jnp.mean((x - mu) ** 2, axis=-1, keepdims=True)
        return (x - mu) / jnp.sqrt(var + eps) * g + b

    xq_n = layer_norm(x_q, params["q_gamma"], params["q_beta"])
    xkv_n = layer_norm(x_kv, params["kv_gamma"], params["kv_beta"])

    q = xq_n @ params["wq_t"] + params["bq"]
    k = xkv_n @ params["wk_t"] + params["bk"]
    v = xkv_n @ params["wv_t"] + params["bv"]

    B, N, Dqk = q.shape
    L = k.shape[1]
    Dv = v.shape[2]
    ch_qk = Dqk // num_heads
    ch_v = Dv // num_heads

    q = q.reshape(B, N, num_heads, ch_qk).transpose(0, 2, 1, 3) * (ch_qk ** -0.5)
    k = k.reshape(B, L, num_heads, ch_qk).transpose(0, 2, 1, 3)
    v = v.reshape(B, L, num_heads, ch_v).transpose(0, 2, 1, 3)

    attn = jnp.einsum("bhic,bhjc->bhij", q, k)
    attn = jax.nn.softmax(attn, axis=-1)
    o = jnp.einsum("bhij,bhjc->bhic", attn, v)
    o = o.transpose(0, 2, 1, 3).reshape(B, N, Dv)
    return o @ params["wo_t"] + params["bo"]


def make_params(key, num_heads, d_q, d_kv, d_qk, d_v, d_out):
    keys = jax.random.split(key, 8)
    scale = 0.02

    def lin(k, d_in, d_out_):
        kw, kb = jax.random.split(k)
        w_t = jax.random.normal(kw, (d_in, d_out_), jnp.float32) * scale
        b = jax.random.normal(kb, (1, d_out_), jnp.float32) * scale
        return w_t, b

    wq_t, bq = lin(keys[0], d_q, d_qk)
    wk_t, bk = lin(keys[1], d_kv, d_qk)
    wv_t, bv = lin(keys[2], d_kv, d_v)
    wo_t, bo = lin(keys[3], d_v, d_out)

    return dict(
        q_gamma=jnp.ones((1, d_q), jnp.float32) + 0.1 * jax.random.normal(keys[4], (1, d_q)),
        q_beta=0.1 * jax.random.normal(keys[5], (1, d_q), jnp.float32),
        kv_gamma=jnp.ones((1, d_kv), jnp.float32) + 0.1 * jax.random.normal(keys[6], (1, d_kv)),
        kv_beta=0.1 * jax.random.normal(keys[7], (1, d_kv), jnp.float32),
        wq_t=wq_t, bq=bq, wk_t=wk_t, bk=bk, wv_t=wv_t, bv=bv, wo_t=wo_t, bo=bo,
    )


if __name__ == "__main__":
    # small shapes consistent with the module's forward
    B, N, L = 2, 8, 16          # batch, query seq, kv seq
    num_heads = 4
    d_q = 32                    # num_q_input_channels
    d_kv = 32                   # num_kv_input_channels
    d_qk = 32                   # num_qk_channels (default = d_q)
    d_v = 32                    # num_v_channels (default = d_qk)
    d_out = 32                  # num_output_channels (default = d_q)

    key = jax.random.PRNGKey(0)
    k_xq, k_xkv, k_params = jax.random.split(key, 3)
    x_q = jax.random.normal(k_xq, (B, N, d_q), jnp.float32)
    x_kv = jax.random.normal(k_xkv, (B, L, d_kv), jnp.float32)

    params = make_params(k_params, num_heads, d_q, d_kv, d_qk, d_v, d_out)

    out = cross_attention_pallas(x_q, x_kv, params, num_heads=num_heads)
    out = jax.block_until_ready(out)

    ref = cross_attention_reference(x_q, x_kv, params, num_heads=num_heads)
    assert out.shape == (B, N, d_out), out.shape
    # tolerance covers the EUP approx reciprocal used in the softmax divide
    max_err = float(jnp.max(jnp.abs(out - ref)))
    assert jnp.allclose(out, ref, atol=1e-3, rtol=1e-3), max_err

    print("KERNEL_OK")
</pallas_src>

<mosaic_0001>
module attributes {stable_mosaic.version = 11 : i64} {
  func.func @_cross_attn_kernel(%arg0: i32, %arg1: memref<8x32xf32, #tpu.memory_space<vmem>>, %arg2: memref<16x32xf32, #tpu.memory_space<vmem>>, %arg3: memref<1x32xf32, #tpu.memory_space<vmem>>, %arg4: memref<1x32xf32, #tpu.memory_space<vmem>>, %arg5: memref<1x32xf32, #tpu.memory_space<vmem>>, %arg6: memref<1x32xf32, #tpu.memory_space<vmem>>, %arg7: memref<4x32x8xf32, #tpu.memory_space<vmem>>, %arg8: memref<4x1x8xf32, #tpu.memory_space<vmem>>, %arg9: memref<4x32x8xf32, #tpu.memory_space<vmem>>, %arg10: memref<4x1x8xf32, #tpu.memory_space<vmem>>, %arg11: memref<4x32x8xf32, #tpu.memory_space<vmem>>, %arg12: memref<4x1x8xf32, #tpu.memory_space<vmem>>, %arg13: memref<4x8x32xf32, #tpu.memory_space<vmem>>, %arg14: memref<1x32xf32, #tpu.memory_space<vmem>>, %arg15: memref<8x32xf32, #tpu.memory_space<vmem>>) attributes {dimension_semantics = [#tpu.dimension_semantics<arbitrary>], iteration_bounds = array<i64: 2>, scalar_prefetch = 0 : i64, scratch_operands = 0 : i64, tpu.core_type = #tpu.core_type<tc>, window_params = [{transform_indices = @transform_0, window_bounds = array<i64: 8, 32>}, {transform_indices = @transform_1, window_bounds = array<i64: 16, 32>}, {pipeline_mode = #tpu.pipeline_mode<synchronous>, transform_indices = @transform_2, window_bounds = array<i64: 1, 32>}, {pipeline_mode = #tpu.pipeline_mode<synchronous>, transform_indices = @transform_3, window_bounds = array<i64: 1, 32>}, {pipeline_mode = #tpu.pipeline_mode<synchronous>, transform_indices = @transform_4, window_bounds = array<i64: 1, 32>}, {pipeline_mode = #tpu.pipeline_mode<synchronous>, transform_indices = @transform_5, window_bounds = array<i64: 1, 32>}, {pipeline_mode = #tpu.pipeline_mode<synchronous>, transform_indices = @transform_6, window_bounds = array<i64: 4, 32, 8>}, {pipeline_mode = #tpu.pipeline_mode<synchronous>, transform_indices = @transform_7, window_bounds = array<i64: 4, 1, 8>}, {pipeline_mode = #tpu.pipeline_mode<synchronous>, transform_indices = @transform_8, window_bounds = array<i64: 4, 32, 8>}, {pipeline_mode = #tpu.pipeline_mode<synchronous>, transform_indices = @transform_9, window_bounds = array<i64: 4, 1, 8>}, {pipeline_mode = #tpu.pipeline_mode<synchronous>, transform_indices = @transform_10, window_bounds = array<i64: 4, 32, 8>}, {pipeline_mode = #tpu.pipeline_mode<synchronous>, transform_indices = @transform_11, window_bounds = array<i64: 4, 1, 8>}, {pipeline_mode = #tpu.pipeline_mode<synchronous>, transform_indices = @transform_12, window_bounds = array<i64: 4, 8, 32>}, {pipeline_mode = #tpu.pipeline_mode<synchronous>, transform_indices = @transform_13, window_bounds = array<i64: 1, 32>}, {transform_indices = @transform_14, window_bounds = array<i64: 8, 32>}]} {
    %c0 = arith.constant 0 : index
    %c0_0 = arith.constant 0 : index
    %0 = vector.load %arg1[%c0, %c0_0] : memref<8x32xf32, #tpu.memory_space<vmem>>, vector<8x32xf32>
    %c0_1 = arith.constant 0 : index
    %c0_2 = arith.constant 0 : index
    %1 = vector.load %arg2[%c0_1, %c0_2] : memref<16x32xf32, #tpu.memory_space<vmem>>, vector<16x32xf32>
    %c0_3 = arith.constant 0 : index
    %c0_4 = arith.constant 0 : index
    %2 = vector.load %arg3[%c0_3, %c0_4] : memref<1x32xf32, #tpu.memory_space<vmem>>, vector<1x32xf32>
    %c0_5 = arith.constant 0 : index
    %c0_6 = arith.constant 0 : index
    %3 = vector.load %arg4[%c0_5, %c0_6] : memref<1x32xf32, #tpu.memory_space<vmem>>, vector<1x32xf32>
    %cst = arith.constant dense<0.000000e+00> : vector<8xf32>
    %4 = vector.multi_reduction <add>, %0, %cst [1] : vector<8x32xf32> to vector<8xf32>
    %5 = vector.shape_cast %4 : vector<8xf32> to vector<8x1xf32>
    %cst_7 = arith.constant 3.200000e+01 : f32
    %6 = vector.broadcast %cst_7 : f32 to vector<8x1xf32>
    %7 = arith.divf %5, %6 : vector<8x1xf32>
    %8 = vector.broadcast %7 : vector<8x1xf32> to vector<8x32xf32>
    %9 = arith.subf %0, %8 : vector<8x32xf32>
    %10 = arith.mulf %9, %9 : vector<8x32xf32>
    %cst_8 = arith.constant dense<0.000000e+00> : vector<8xf32>
    %11 = vector.multi_reduction <add>, %10, %cst_8 [1] : vector<8x32xf32> to vector<8xf32>
    %12 = vector.shape_cast %11 : vector<8xf32> to vector<8x1xf32>
    %cst_9 = arith.constant 3.200000e+01 : f32
    %13 = vector.broadcast %cst_9 : f32 to vector<8x1xf32>
    %14 = arith.divf %12, %13 : vector<8x1xf32>
    %15 = vector.broadcast %7 : vector<8x1xf32> to vector<8x32xf32>
    %16 = arith.subf %0, %15 : vector<8x32xf32>
    %cst_10 = arith.constant 9.99999974E-6 : f32
    %17 = vector.broadcast %cst_10 : f32 to vector<8x1xf32>
    %18 = arith.addf %14, %17 : vector<8x1xf32>
    %19 = math.rsqrt %18 : vector<8x1xf32>
    %20 = vector.broadcast %19 : vector<8x1xf32> to vector<8x32xf32>
    %21 = arith.mulf %16, %20 : vector<8x32xf32>
    %22 = vector.broadcast %2 : vector<1x32xf32> to vector<8x32xf32>
    %23 = arith.mulf %21, %22 : vector<8x32xf32>
    %24 = vector.broadcast %3 : vector<1x32xf32> to vector<8x32xf32>
    %25 = arith.addf %23, %24 : vector<8x32xf32>
    %c0_11 = arith.constant 0 : index
    %c0_12 = arith.constant 0 : index
    %26 = vector.load %arg5[%c0_11, %c0_12] : memref<1x32xf32, #tpu.memory_space<vmem>>, vector<1x32xf32>
    %c0_13 = arith.constant 0 : index
    %c0_14 = arith.constant 0 : index
    %27 = vector.load %arg6[%c0_13, %c0_14] : memref<1x32xf32, #tpu.memory_space<vmem>>, vector<1x32xf32>
    %cst_15 = arith.constant dense<0.000000e+00> : vector<16xf32>
    %28 = vector.multi_reduction <add>, %1, %cst_15 [1] : vector<16x32xf32> to vector<16xf32>
    %29 = vector.shape_cast %28 : vector<16xf32> to vector<16x1xf32>
    %cst_16 = arith.constant 3.200000e+01 : f32
    %30 = vector.broadcast %cst_16 : f32 to vector<16x1xf32>
    %31 = arith.divf %29, %30 : vector<16x1xf32>
    %32 = vector.broadcast %31 : vector<16x1xf32> to vector<16x32xf32>
    %33 = arith.subf %1, %32 : vector<16x32xf32>
    %34 = arith.mulf %33, %33 : vector<16x32xf32>
    %cst_17 = arith.constant dense<0.000000e+00> : vector<16xf32>
    %35 = vector.multi_reduction <add>, %34, %cst_17 [1] : vector<16x32xf32> to vector<16xf32>
    %36 = vector.shape_cast %35 : vector<16xf32> to vector<16x1xf32>
    %cst_18 = arith.constant 3.200000e+01 : f32
    %37 = vector.broadcast %cst_18 : f32 to vector<16x1xf32>
    %38 = arith.divf %36, %37 : vector<16x1xf32>
    %39 = vector.broadcast %31 : vector<16x1xf32> to vector<16x32xf32>
    %40 = arith.subf %1, %39 : vector<16x32xf32>
    %cst_19 = arith.constant 9.99999974E-6 : f32
    %41 = vector.broadcast %cst_19 : f32 to vector<16x1xf32>
    %42 = arith.addf %38, %41 : vector<16x1xf32>
    %43 = math.rsqrt %42 : vector<16x1xf32>
    %44 = vector.broadcast %43 : vector<16x1xf32> to vector<16x32xf32>
    %45 = arith.mulf %40, %44 : vector<16x32xf32>
    %46 = vector.broadcast %26 : vector<1x32xf32> to vector<16x32xf32>
    %47 = arith.mulf %45, %46 : vector<16x32xf32>
    %48 = vector.broadcast %27 : vector<1x32xf32> to vector<16x32xf32>
    %49 = arith.addf %47, %48 : vector<16x32xf32>
    %cst_20 = arith.constant 0.000000e+00 : f32
    %50 = vector.broadcast %cst_20 : f32 to vector<8x32xf32>
    %c0_21 = arith.constant 0 : index
    %c0_22 = arith.constant 0 : index
    %c0_23 = arith.constant 0 : index
    %51 = vector.load %arg7[%c0_21, %c0_22, %c0_23] : memref<4x32x8xf32, #tpu.memory_space<vmem>>, vector<1x32x8xf32>
    %52 = vector.shape_cast %51 : vector<1x32x8xf32> to vector<32x8xf32>
    %cst_24 = arith.constant dense<0.000000e+00> : vector<8x8xf32>
    %53 = tpu.matmul %25, %52, %cst_24 {dimension_numbers = #tpu.dot_dimension_numbers<[1], [0], [0], [1], [0, 0, 1, 1], [], []>} : vector<8x32xf32>, vector<32x8xf32>, vector<8x8xf32> -> vector<8x8xf32>
    %c0_25 = arith.constant 0 : index
    %c0_26 = arith.constant 0 : index
    %c0_27 = arith.constant 0 : index
    %54 = vector.load %arg8[%c0_25, %c0_26, %c0_27] : memref<4x1x8xf32, #tpu.memory_space<vmem>>, vector<1x1x8xf32>
    %55 = vector.shape_cast %54 : vector<1x1x8xf32> to vector<1x8xf32>
    %56 = vector.broadcast %55 : vector<1x8xf32> to vector<8x8xf32>
    %57 = arith.addf %53, %56 : vector<8x8xf32>
    %c0_28 = arith.constant 0 : index
    %c0_29 = arith.constant 0 : index
    %c0_30 = arith.constant 0 : index
    %58 = vector.load %arg9[%c0_28, %c0_29, %c0_30] : memref<4x32x8xf32, #tpu.memory_space<vmem>>, vector<1x32x8xf32>
    %59 = vector.shape_cast %58 : vector<1x32x8xf32> to vector<32x8xf32>
    %cst_31 = arith.constant dense<0.000000e+00> : vector<16x8xf32>
    %60 = tpu.matmul %49, %59, %cst_31 {dimension_numbers = #tpu.dot_dimension_numbers<[1], [0], [0], [1], [0, 0, 1, 1], [], []>} : vector<16x32xf32>, vector<32x8xf32>, vector<16x8xf32> -> vector<16x8xf32>
    %c0_32 = arith.constant 0 : index
    %c0_33 = arith.constant 0 : index
    %c0_34 = arith.constant 0 : index
    %61 = vector.load %arg10[%c0_32, %c0_33, %c0_34] : memref<4x1x8xf32, #tpu.memory_space<vmem>>, vector<1x1x8xf32>
    %62 = vector.shape_cast %61 : vector<1x1x8xf32> to vector<1x8xf32>
    %63 = vector.broadcast %62 : vector<1x8xf32> to vector<16x8xf32>
    %64 = arith.addf %60, %63 : vector<16x8xf32>
    %c0_35 = arith.constant 0 : index
    %c0_36 = arith.constant 0 : index
    %c0_37 = arith.constant 0 : index
    %65 = vector.load %arg11[%c0_35, %c0_36, %c0_37] : memref<4x32x8xf32, #tpu.memory_space<vmem>>, vector<1x32x8xf32>
    %66 = vector.shape_cast %65 : vector<1x32x8xf32> to vector<32x8xf32>
    %cst_38 = arith.constant dense<0.000000e+00> : vector<16x8xf32>
    %67 = tpu.matmul %49, %66, %cst_38 {dimension_numbers = #tpu.dot_dimension_numbers<[1], [0], [0], [1], [0, 0, 1, 1], [], []>} : vector<16x32xf32>, vector<32x8xf32>, vector<16x8xf32> -> vector<16x8xf32>
    %c0_39 = arith.constant 0 : index
    %c0_40 = arith.constant 0 : index
    %c0_41 = arith.constant 0 : index
    %68 = vector.load %arg12[%c0_39, %c0_40, %c0_41] : memref<4x1x8xf32, #tpu.memory_space<vmem>>, vector<1x1x8xf32>
    %69 = vector.shape_cast %68 : vector<1x1x8xf32> to vector<1x8xf32>
    %70 = vector.broadcast %69 : vector<1x8xf32> to vector<16x8xf32>
    %71 = arith.addf %67, %70 : vector<16x8xf32>
    %cst_42 = arith.constant dense<0.000000e+00> : vector<8x16xf32>
    %72 = tpu.matmul %57, %64, %cst_42 {dimension_numbers = #tpu.dot_dimension_numbers<[1], [1], [0], [0], [0, 0, 1, 0], [], []>} : vector<8x8xf32>, vector<16x8xf32>, vector<8x16xf32> -> vector<8x16xf32>
    %cst_43 = arith.constant dense<0xFF800000> : vector<8xf32>
    %73 = vector.multi_reduction <maximumf>, %72, %cst_43 [1] : vector<8x16xf32> to vector<8xf32>
    %74 = vector.shape_cast %73 : vector<8xf32> to vector<8x1xf32>
    %75 = vector.broadcast %74 : vector<8x1xf32> to vector<8x16xf32>
    %76 = arith.subf %72, %75 : vector<8x16xf32>
    %77 = math.exp %76 : vector<8x16xf32>
    %cst_44 = arith.constant dense<0.000000e+00> : vector<8xf32>
    %78 = vector.multi_reduction <add>, %77, %cst_44 [1] : vector<8x16xf32> to vector<8xf32>
    %79 = vector.shape_cast %78 : vector<8xf32> to vector<8x1xf32>
    %80 = tpu.reciprocal %79 {approx = true} : vector<8x1xf32> -> vector<8x1xf32>
    %81 = vector.broadcast %80 : vector<8x1xf32> to vector<8x16xf32>
    %82 = arith.mulf %77, %81 : vector<8x16xf32>
    %cst_45 = arith.constant dense<0.000000e+00> : vector<8x8xf32>
    %83 = tpu.matmul %82, %71, %cst_45 {dimension_numbers = #tpu.dot_dimension_numbers<[1], [0], [0], [1], [0, 0, 1, 1], [], []>} : vector<8x16xf32>, vector<16x8xf32>, vector<8x8xf32> -> vector<8x8xf32>
    %c0_46 = arith.constant 0 : index
    %c0_47 = arith.constant 0 : index
    %c0_48 = arith.constant 0 : index
    %84 = vector.load %arg13[%c0_46, %c0_47, %c0_48] : memref<4x8x32xf32, #tpu.memory_space<vmem>>, vector<1x8x32xf32>
    %85 = vector.shape_cast %84 : vector<1x8x32xf32> to vector<8x32xf32>
    %cst_49 = arith.constant dense<0.000000e+00> : vector<8x32xf32>
    %86 = tpu.matmul %83, %85, %cst_49 {dimension_numbers = #tpu.dot_dimension_numbers<[1], [0], [0], [1], [0, 0, 1, 1], [], []>} : vector<8x8xf32>, vector<8x32xf32>, vector<8x32xf32> -> vector<8x32xf32>
    %87 = arith.addf %50, %86 : vector<8x32xf32>
    %c1 = arith.constant 1 : index
    %c0_50 = arith.constant 0 : index
    %c0_51 = arith.constant 0 : index
    %88 = vector.load %arg7[%c1, %c0_50, %c0_51] : memref<4x32x8xf32, #tpu.memory_space<vmem>>, vector<1x32x8xf32>
    %89 = vector.shape_cast %88 : vector<1x32x8xf32> to vector<32x8xf32>
    %cst_52 = arith.constant dense<0.000000e+00> : vector<8x8xf32>
    %90 = tpu.matmul %25, %89, %cst_52 {dimension_numbers = #tpu.dot_dimension_numbers<[1], [0], [0], [1], [0, 0, 1, 1], [], []>} : vector<8x32xf32>, vector<32x8xf32>, vector<8x8xf32> -> vector<8x8xf32>
    %c1_53 = arith.constant 1 : index
    %c0_54 = arith.constant 0 : index
    %c0_55 = arith.constant 0 : index
    %91 = vector.load %arg8[%c1_53, %c0_54, %c0_55] : memref<4x1x8xf32, #tpu.memory_space<vmem>>, vector<1x1x8xf32>
    %92 = vector.shape_cast %91 : vector<1x1x8xf32> to vector<1x8xf32>
    %93 = vector.broadcast %92 : vector<1x8xf32> to vector<8x8xf32>
    %94 = arith.addf %90, %93 : vector<8x8xf32>
    %c1_56 = arith.constant 1 : index
    %c0_57 = arith.constant 0 : index
    %c0_58 = arith.constant 0 : index
    %95 = vector.load %arg9[%c1_56, %c0_57, %c0_58] : memref<4x32x8xf32, #tpu.memory_space<vmem>>, vector<1x32x8xf32>
    %96 = vector.shape_cast %95 : vector<1x32x8xf32> to vector<32x8xf32>
    %cst_59 = arith.constant dense<0.000000e+00> : vector<16x8xf32>
    %97 = tpu.matmul %49, %96, %cst_59 {dimension_numbers = #tpu.dot_dimension_numbers<[1], [0], [0], [1], [0, 0, 1, 1], [], []>} : vector<16x32xf32>, vector<32x8xf32>, vector<16x8xf32> -> vector<16x8xf32>
    %c1_60 = arith.constant 1 : index
    %c0_61 = arith.constant 0 : index
    %c0_62 = arith.constant 0 : index
    %98 = vector.load %arg10[%c1_60, %c0_61, %c0_62] : memref<4x1x8xf32, #tpu.memory_space<vmem>>, vector<1x1x8xf32>
    %99 = vector.shape_cast %98 : vector<1x1x8xf32> to vector<1x8xf32>
    %100 = vector.broadcast %99 : vector<1x8xf32> to vector<16x8xf32>
    %101 = arith.addf %97, %100 : vector<16x8xf32>
    %c1_63 = arith.constant 1 : index
    %c0_64 = arith.constant 0 : index
    %c0_65 = arith.constant 0 : index
    %102 = vector.load %arg11[%c1_63, %c0_64, %c0_65] : memref<4x32x8xf32, #tpu.memory_space<vmem>>, vector<1x32x8xf32>
    %103 = vector.shape_cast %102 : vector<1x32x8xf32> to vector<32x8xf32>
    %cst_66 = arith.constant dense<0.000000e+00> : vector<16x8xf32>
    %104 = tpu.matmul %49, %103, %cst_66 {dimension_numbers = #tpu.dot_dimension_numbers<[1], [0], [0], [1], [0, 0, 1, 1], [], []>} : vector<16x32xf32>, vector<32x8xf32>, vector<16x8xf32> -> vector<16x8xf32>
    %c1_67 = arith.constant 1 : index
    %c0_68 = arith.constant 0 : index
    %c0_69 = arith.constant 0 : index
    %105 = vector.load %arg12[%c1_67, %c0_68, %c0_69] : memref<4x1x8xf32, #tpu.memory_space<vmem>>, vector<1x1x8xf32>
    %106 = vector.shape_cast %105 : vector<1x1x8xf32> to vector<1x8xf32>
    %107 = vector.broadcast %106 : vector<1x8xf32> to vector<16x8xf32>
    %108 = arith.addf %104, %107 : vector<16x8xf32>
    %cst_70 = arith.constant dense<0.000000e+00> : vector<8x16xf32>
    %109 = tpu.matmul %94, %101, %cst_70 {dimension_numbers = #tpu.dot_dimension_numbers<[1], [1], [0], [0], [0, 0, 1, 0], [], []>} : vector<8x8xf32>, vector<16x8xf32>, vector<8x16xf32> -> vector<8x16xf32>
    %cst_71 = arith.constant dense<0xFF800000> : vector<8xf32>
    %110 = vector.multi_reduction <maximumf>, %109, %cst_71 [1] : vector<8x16xf32> to vector<8xf32>
    %111 = vector.shape_cast %110 : vector<8xf32> to vector<8x1xf32>
    %112 = vector.broadcast %111 : vector<8x1xf32> to vector<8x16xf32>
    %113 = arith.subf %109, %112 : vector<8x16xf32>
    %114 = math.exp %113 : vector<8x16xf32>
    %cst_72 = arith.constant dense<0.000000e+00> : vector<8xf32>
    %115 = vector.multi_reduction <add>, %114, %cst_72 [1] : vector<8x16xf32> to vector<8xf32>
    %116 = vector.shape_cast %115 : vector<8xf32> to vector<8x1xf32>
    %117 = tpu.reciprocal %116 {approx = true} : vector<8x1xf32> -> vector<8x1xf32>
    %118 = vector.broadcast %117 : vector<8x1xf32> to vector<8x16xf32>
    %119 = arith.mulf %114, %118 : vector<8x16xf32>
    %cst_73 = arith.constant dense<0.000000e+00> : vector<8x8xf32>
    %120 = tpu.matmul %119, %108, %cst_73 {dimension_numbers = #tpu.dot_dimension_numbers<[1], [0], [0], [1], [0, 0, 1, 1], [], []>} : vector<8x16xf32>, vector<16x8xf32>, vector<8x8xf32> -> vector<8x8xf32>
    %c1_74 = arith.constant 1 : index
    %c0_75 = arith.constant 0 : index
    %c0_76 = arith.constant 0 : index
    %121 = vector.load %arg13[%c1_74, %c0_75, %c0_76] : memref<4x8x32xf32, #tpu.memory_space<vmem>>, vector<1x8x32xf32>
    %122 = vector.shape_cast %121 : vector<1x8x32xf32> to vector<8x32xf32>
    %cst_77 = arith.constant dense<0.000000e+00> : vector<8x32xf32>
    %123 = tpu.matmul %120, %122, %cst_77 {dimension_numbers = #tpu.dot_dimension_numbers<[1], [0], [0], [1], [0, 0, 1, 1], [], []>} : vector<8x8xf32>, vector<8x32xf32>, vector<8x32xf32> -> vector<8x32xf32>
    %124 = arith.addf %87, %123 : vector<8x32xf32>
    %c2 = arith.constant 2 : index
    %c0_78 = arith.constant 0 : index
    %c0_79 = arith.constant 0 : index
    %125 = vector.load %arg7[%c2, %c0_78, %c0_79] : memref<4x32x8xf32, #tpu.memory_space<vmem>>, vector<1x32x8xf32>
    %126 = vector.shape_cast %125 : vector<1x32x8xf32> to vector<32x8xf32>
    %cst_80 = arith.constant dense<0.000000e+00> : vector<8x8xf32>
    %127 = tpu.matmul %25, %126, %cst_80 {dimension_numbers = #tpu.dot_dimension_numbers<[1], [0], [0], [1], [0, 0, 1, 1], [], []>} : vector<8x32xf32>, vector<32x8xf32>, vector<8x8xf32> -> vector<8x8xf32>
    %c2_81 = arith.constant 2 : index
    %c0_82 = arith.constant 0 : index
    %c0_83 = arith.constant 0 : index
    %128 = vector.load %arg8[%c2_81, %c0_82, %c0_83] : memref<4x1x8xf32, #tpu.memory_space<vmem>>, vector<1x1x8xf32>
    %129 = vector.shape_cast %128 : vector<1x1x8xf32> to vector<1x8xf32>
    %130 = vector.broadcast %129 : vector<1x8xf32> to vector<8x8xf32>
    %131 = arith.addf %127, %130 : vector<8x8xf32>
    %c2_84 = arith.constant 2 : index
    %c0_85 = arith.constant 0 : index
    %c0_86 = arith.constant 0 : index
    %132 = vector.load %arg9[%c2_84, %c0_85, %c0_86] : memref<4x32x8xf32, #tpu.memory_space<vmem>>, vector<1x32x8xf32>
    %133 = vector.shape_cast %132 : vector<1x32x8xf32> to vector<32x8xf32>
    %cst_87 = arith.constant dense<0.000000e+00> : vector<16x8xf32>
    %134 = tpu.matmul %49, %133, %cst_87 {dimension_numbers = #tpu.dot_dimension_numbers<[1], [0], [0], [1], [0, 0, 1, 1], [], []>} : vector<16x32xf32>, vector<32x8xf32>, vector<16x8xf32> -> vector<16x8xf32>
    %c2_88 = arith.constant 2 : index
    %c0_89 = arith.constant 0 : index
    %c0_90 = arith.constant 0 : index
    %135 = vector.load %arg10[%c2_88, %c0_89, %c0_90] : memref<4x1x8xf32, #tpu.memory_space<vmem>>, vector<1x1x8xf32>
    %136 = vector.shape_cast %135 : vector<1x1x8xf32> to vector<1x8xf32>
    %137 = vector.broadcast %136 : vector<1x8xf32> to vector<16x8xf32>
    %138 = arith.addf %134, %137 : vector<16x8xf32>
    %c2_91 = arith.constant 2 : index
    %c0_92 = arith.constant 0 : index
    %c0_93 = arith.constant 0 : index
    %139 = vector.load %arg11[%c2_91, %c0_92, %c0_93] : memref<4x32x8xf32, #tpu.memory_space<vmem>>, vector<1x32x8xf32>
    %140 = vector.shape_cast %139 : vector<1x32x8xf32> to vector<32x8xf32>
    %cst_94 = arith.constant dense<0.000000e+00> : vector<16x8xf32>
    %141 = tpu.matmul %49, %140, %cst_94 {dimension_numbers = #tpu.dot_dimension_numbers<[1], [0], [0], [1], [0, 0, 1, 1], [], []>} : vector<16x32xf32>, vector<32x8xf32>, vector<16x8xf32> -> vector<16x8xf32>
    %c2_95 = arith.constant 2 : index
    %c0_96 = arith.constant 0 : index
    %c0_97 = arith.constant 0 : index
    %142 = vector.load %arg12[%c2_95, %c0_96, %c0_97] : memref<4x1x8xf32, #tpu.memory_space<vmem>>, vector<1x1x8xf32>
    %143 = vector.shape_cast %142 : vector<1x1x8xf32> to vector<1x8xf32>
    %144 = vector.broadcast %143 : vector<1x8xf32> to vector<16x8xf32>
    %145 = arith.addf %141, %144 : vector<16x8xf32>
    %cst_98 = arith.constant dense<0.000000e+00> : vector<8x16xf32>
    %146 = tpu.matmul %131, %138, %cst_98 {dimension_numbers = #tpu.dot_dimension_numbers<[1], [1], [0], [0], [0, 0, 1, 0], [], []>} : vector<8x8xf32>, vector<16x8xf32>, vector<8x16xf32> -> vector<8x16xf32>
    %cst_99 = arith.constant dense<0xFF800000> : vector<8xf32>
    %147 = vector.multi_reduction <maximumf>, %146, %cst_99 [1] : vector<8x16xf32> to vector<8xf32>
    %148 = vector.shape_cast %147 : vector<8xf32> to vector<8x1xf32>
    %149 = vector.broadcast %148 : vector<8x1xf32> to vector<8x16xf32>
    %150 = arith.subf %146, %149 : vector<8x16xf32>
    %151 = math.exp %150 : vector<8x16xf32>
    %cst_100 = arith.constant dense<0.000000e+00> : vector<8xf32>
    %152 = vector.multi_reduction <add>, %151, %cst_100 [1] : vector<8x16xf32> to vector<8xf32>
    %153 = vector.shape_cast %152 : vector<8xf32> to vector<8x1xf32>
    %154 = tpu.reciprocal %153 {approx = true} : vector<8x1xf32> -> vector<8x1xf32>
    %155 = vector.broadcast %154 : vector<8x1xf32> to vector<8x16xf32>
    %156 = arith.mulf %151, %155 : vector<8x16xf32>
    %cst_101 = arith.constant dense<0.000000e+00> : vector<8x8xf32>
    %157 = tpu.matmul %156, %145, %cst_101 {dimension_numbers = #tpu.dot_dimension_numbers<[1], [0], [0], [1], [0, 0, 1, 1], [], []>} : vector<8x16xf32>, vector<16x8xf32>, vector<8x8xf32> -> vector<8x8xf32>
    %c2_102 = arith.constant 2 : index
    %c0_103 = arith.constant 0 : index
    %c0_104 = arith.constant 0 : index
    %158 = vector.load %arg13[%c2_102, %c0_103, %c0_104] : memref<4x8x32xf32, #tpu.memory_space<vmem>>, vector<1x8x32xf32>
    %159 = vector.shape_cast %158 : vector<1x8x32xf32> to vector<8x32xf32>
    %cst_105 = arith.constant dense<0.000000e+00> : vector<8x32xf32>
    %160 = tpu.matmul %157, %159, %cst_105 {dimension_numbers = #tpu.dot_dimension_numbers<[1], [0], [0], [1], [0, 0, 1, 1], [], []>} : vector<8x8xf32>, vector<8x32xf32>, vector<8x32xf32> -> vector<8x32xf32>
    %161 = arith.addf %124, %160 : vector<8x32xf32>
    %c3 = arith.constant 3 : index
    %c0_106 = arith.constant 0 : index
    %c0_107 = arith.constant 0 : index
    %162 = vector.load %arg7[%c3, %c0_106, %c0_107] : memref<4x32x8xf32, #tpu.memory_space<vmem>>, vector<1x32x8xf32>
    %163 = vector.shape_cast %162 : vector<1x32x8xf32> to vector<32x8xf32>
    %cst_108 = arith.constant dense<0.000000e+00> : vector<8x8xf32>
    %164 = tpu.matmul %25, %163, %cst_108 {dimension_numbers = #tpu.dot_dimension_numbers<[1], [0], [0], [1], [0, 0, 1, 1], [], []>} : vector<8x32xf32>, vector<32x8xf32>, vector<8x8xf32> -> vector<8x8xf32>
    %c3_109 = arith.constant 3 : index
    %c0_110 = arith.constant 0 : index
    %c0_111 = arith.constant 0 : index
    %165 = vector.load %arg8[%c3_109, %c0_110, %c0_111] : memref<4x1x8xf32, #tpu.memory_space<vmem>>, vector<1x1x8xf32>
    %166 = vector.shape_cast %165 : vector<1x1x8xf32> to vector<1x8xf32>
    %167 = vector.broadcast %166 : vector<1x8xf32> to vector<8x8xf32>
    %168 = arith.addf %164, %167 : vector<8x8xf32>
    %c3_112 = arith.constant 3 : index
    %c0_113 = arith.constant 0 : index
    %c0_114 = arith.constant 0 : index
    %169 = vector.load %arg9[%c3_112, %c0_113, %c0_114] : memref<4x32x8xf32, #tpu.memory_space<vmem>>, vector<1x32x8xf32>
    %170 = vector.shape_cast %169 : vector<1x32x8xf32> to vector<32x8xf32>
    %cst_115 = arith.constant dense<0.000000e+00> : vector<16x8xf32>
    %171 = tpu.matmul %49, %170, %cst_115 {dimension_numbers = #tpu.dot_dimension_numbers<[1], [0], [0], [1], [0, 0, 1, 1], [], []>} : vector<16x32xf32>, vector<32x8xf32>, vector<16x8xf32> -> vector<16x8xf32>
    %c3_116 = arith.constant 3 : index
    %c0_117 = arith.constant 0 : index
    %c0_118 = arith.constant 0 : index
    %172 = vector.load %arg10[%c3_116, %c0_117, %c0_118] : memref<4x1x8xf32, #tpu.memory_space<vmem>>, vector<1x1x8xf32>
    %173 = vector.shape_cast %172 : vector<1x1x8xf32> to vector<1x8xf32>
    %174 = vector.broadcast %173 : vector<1x8xf32> to vector<16x8xf32>
    %175 = arith.addf %171, %174 : vector<16x8xf32>
    %c3_119 = arith.constant 3 : index
    %c0_120 = arith.constant 0 : index
    %c0_121 = arith.constant 0 : index
    %176 = vector.load %arg11[%c3_119, %c0_120, %c0_121] : memref<4x32x8xf32, #tpu.memory_space<vmem>>, vector<1x32x8xf32>
    %177 = vector.shape_cast %176 : vector<1x32x8xf32> to vector<32x8xf32>
    %cst_122 = arith.constant dense<0.000000e+00> : vector<16x8xf32>
    %178 = tpu.matmul %49, %177, %cst_122 {dimension_numbers = #tpu.dot_dimension_numbers<[1], [0], [0], [1], [0, 0, 1, 1], [], []>} : vector<16x32xf32>, vector<32x8xf32>, vector<16x8xf32> -> vector<16x8xf32>
    %c3_123 = arith.constant 3 : index
    %c0_124 = arith.constant 0 : index
    %c0_125 = arith.constant 0 : index
    %179 = vector.load %arg12[%c3_123, %c0_124, %c0_125] : memref<4x1x8xf32, #tpu.memory_space<vmem>>, vector<1x1x8xf32>
    %180 = vector.shape_cast %179 : vector<1x1x8xf32> to vector<1x8xf32>
    %181 = vector.broadcast %180 : vector<1x8xf32> to vector<16x8xf32>
    %182 = arith.addf %178, %181 : vector<16x8xf32>
    %cst_126 = arith.constant dense<0.000000e+00> : vector<8x16xf32>
    %183 = tpu.matmul %168, %175, %cst_126 {dimension_numbers = #tpu.dot_dimension_numbers<[1], [1], [0], [0], [0, 0, 1, 0], [], []>} : vector<8x8xf32>, vector<16x8xf32>, vector<8x16xf32> -> vector<8x16xf32>
    %cst_127 = arith.constant dense<0xFF800000> : vector<8xf32>
    %184 = vector.multi_reduction <maximumf>, %183, %cst_127 [1] : vector<8x16xf32> to vector<8xf32>
    %185 = vector.shape_cast %184 : vector<8xf32> to vector<8x1xf32>
    %186 = vector.broadcast %185 : vector<8x1xf32> to vector<8x16xf32>
    %187 = arith.subf %183, %186 : vector<8x16xf32>
    %188 = math.exp %187 : vector<8x16xf32>
    %cst_128 = arith.constant dense<0.000000e+00> : vector<8xf32>
    %189 = vector.multi_reduction <add>, %188, %cst_128 [1] : vector<8x16xf32> to vector<8xf32>
    %190 = vector.shape_cast %189 : vector<8xf32> to vector<8x1xf32>
    %191 = tpu.reciprocal %190 {approx = true} : vector<8x1xf32> -> vector<8x1xf32>
    %192 = vector.broadcast %191 : vector<8x1xf32> to vector<8x16xf32>
    %193 = arith.mulf %188, %192 : vector<8x16xf32>
    %cst_129 = arith.constant dense<0.000000e+00> : vector<8x8xf32>
    %194 = tpu.matmul %193, %182, %cst_129 {dimension_numbers = #tpu.dot_dimension_numbers<[1], [0], [0], [1], [0, 0, 1, 1], [], []>} : vector<8x16xf32>, vector<16x8xf32>, vector<8x8xf32> -> vector<8x8xf32>
    %c3_130 = arith.constant 3 : index
    %c0_131 = arith.constant 0 : index
    %c0_132 = arith.constant 0 : index
    %195 = vector.load %arg13[%c3_130, %c0_131, %c0_132] : memref<4x8x32xf32, #tpu.memory_space<vmem>>, vector<1x8x32xf32>
    %196 = vector.shape_cast %195 : vector<1x8x32xf32> to vector<8x32xf32>
    %cst_133 = arith.constant dense<0.000000e+00> : vector<8x32xf32>
    %197 = tpu.matmul %194, %196, %cst_133 {dimension_numbers = #tpu.dot_dimension_numbers<[1], [0], [0], [1], [0, 0, 1, 1], [], []>} : vector<8x8xf32>, vector<8x32xf32>, vector<8x32xf32> -> vector<8x32xf32>
    %198 = arith.addf %161, %197 : vector<8x32xf32>
    %c0_134 = arith.constant 0 : index
    %c0_135 = arith.constant 0 : index
    %199 = vector.load %arg14[%c0_134, %c0_135] : memref<1x32xf32, #tpu.memory_space<vmem>>, vector<1x32xf32>
    %200 = vector.broadcast %199 : vector<1x32xf32> to vector<8x32xf32>
    %201 = arith.addf %198, %200 : vector<8x32xf32>
    %c0_136 = arith.constant 0 : index
    %c0_137 = arith.constant 0 : index
    %202 = vector.load %arg15[%c0_136, %c0_137] : memref<8x32xf32, #tpu.memory_space<vmem>>, vector<8x32xf32>
    tpu.vector_store %arg15[%c0_136, %c0_137], %201 {strides = array<i32>} : memref<8x32xf32, #tpu.memory_space<vmem>>, vector<8x32xf32>,
    return
  }
  func.func @transform_0(%arg0: i32) -> (i32, i32) {
    %c0_i32 = arith.constant 0 : i32
    %c0_i32_0 = arith.constant 0 : i32
    return %arg0, %c0_i32 : i32, i32
  }
  func.func @transform_1(%arg0: i32) -> (i32, i32) {
    %c0_i32 = arith.constant 0 : i32
    %c0_i32_0 = arith.constant 0 : i32
    return %arg0, %c0_i32 : i32, i32
  }
  func.func @transform_2(%arg0: i32) -> (i32, i32) {
    %c0_i32 = arith.constant 0 : i32
    %c0_i32_0 = arith.constant 0 : i32
    %c0_i32_1 = arith.constant 0 : i32
    return %c0_i32, %c0_i32_0 : i32, i32
  }
  func.func @transform_3(%arg0: i32) -> (i32, i32) {
    %c0_i32 = arith.constant 0 : i32
    %c0_i32_0 = arith.constant 0 : i32
    %c0_i32_1 = arith.constant 0 : i32
    return %c0_i32, %c0_i32_0 : i32, i32
  }
  func.func @transform_4(%arg0: i32) -> (i32, i32) {
    %c0_i32 = arith.constant 0 : i32
    %c0_i32_0 = arith.constant 0 : i32
    %c0_i32_1 = arith.constant 0 : i32
    return %c0_i32, %c0_i32_0 : i32, i32
  }
  func.func @transform_5(%arg0: i32) -> (i32, i32) {
    %c0_i32 = arith.constant 0 : i32
    %c0_i32_0 = arith.constant 0 : i32
    %c0_i32_1 = arith.constant 0 : i32
    return %c0_i32, %c0_i32_0 : i32, i32
  }
  func.func @transform_6(%arg0: i32) -> (i32, i32, i32) {
    %c0_i32 = arith.constant 0 : i32
    %c0_i32_0 = arith.constant 0 : i32
    %c0_i32_1 = arith.constant 0 : i32
    %c0_i32_2 = arith.constant 0 : i32
    return %c0_i32, %c0_i32_0, %c0_i32_1 : i32, i32, i32
  }
  func.func @transform_7(%arg0: i32) -> (i32, i32, i32) {
    %c0_i32 = arith.constant 0 : i32
    %c0_i32_0 = arith.constant 0 : i32
    %c0_i32_1 = arith.constant 0 : i32
    %c0_i32_2 = arith.constant 0 : i32
    return %c0_i32, %c0_i32_0, %c0_i32_1 : i32, i32, i32
  }
  func.func @transform_8(%arg0: i32) -> (i32, i32, i32) {
    %c0_i32 = arith.constant 0 : i32
    %c0_i32_0 = arith.constant 0 : i32
    %c0_i32_1 = arith.constant 0 : i32
    %c0_i32_2 = arith.constant 0 : i32
    return %c0_i32, %c0_i32_0, %c0_i32_1 : i32, i32, i32
  }
  func.func @transform_9(%arg0: i32) -> (i32, i32, i32) {
    %c0_i32 = arith.constant 0 : i32
    %c0_i32_0 = arith.constant 0 : i32
    %c0_i32_1 = arith.constant 0 : i32
    %c0_i32_2 = arith.constant 0 : i32
    return %c0_i32, %c0_i32_0, %c0_i32_1 : i32, i32, i32
  }
  func.func @transform_10(%arg0: i32) -> (i32, i32, i32) {
    %c0_i32 = arith.constant 0 : i32
    %c0_i32_0 = arith.constant 0 : i32
    %c0_i32_1 = arith.constant 0 : i32
    %c0_i32_2 = arith.constant 0 : i32
    return %c0_i32, %c0_i32_0, %c0_i32_1 : i32, i32, i32
  }
  func.func @transform_11(%arg0: i32) -> (i32, i32, i32) {
    %c0_i32 = arith.constant 0 : i32
    %c0_i32_0 = arith.constant 0 : i32
    %c0_i32_1 = arith.constant 0 : i32
    %c0_i32_2 = arith.constant 0 : i32
    return %c0_i32, %c0_i32_0, %c0_i32_1 : i32, i32, i32
  }
  func.func @transform_12(%arg0: i32) -> (i32, i32, i32) {
    %c0_i32 = arith.constant 0 : i32
    %c0_i32_0 = arith.constant 0 : i32
    %c0_i32_1 = arith.constant 0 : i32
    %c0_i32_2 = arith.constant 0 : i32
    return %c0_i32, %c0_i32_0, %c0_i32_1 : i32, i32, i32
  }
  func.func @transform_13(%arg0: i32) -> (i32, i32) {
    %c0_i32 = arith.constant 0 : i32
    %c0_i32_0 = arith.constant 0 : i32
    %c0_i32_1 = arith.constant 0 : i32
    return %c0_i32, %c0_i32_0 : i32, i32
  }
  func.func @transform_14(%arg0: i32) -> (i32, i32) {
    %c0_i32 = arith.constant 0 : i32
    %c0_i32_0 = arith.constant 0 : i32
    return %arg0, %c0_i32 : i32, i32
  }
}

</mosaic_0001>

<bundles_post_ra>
// kernel: tpu_custom_call.1
= control target key start
LH: loop header
LB: loop body
LE: loop exit
PB: predicated region body
PF: predicated region fallthrough
CT: control target
= control target key end

     0   :  { %s2140_s0 = inlined_call_operand.vmem [shape: f32[16,32], index: 0, kind: input, shape index: {}]   ;;  %s2141_s1 = inlined_call_operand.vmem [shape: f32[32,32], index: 1, kind: input, shape index: {}]   ;;  %s2142_s2 = inlined_call_operand.vmem [shape: f32[1,32], index: 2, kind: input, shape index: {}]   ;;  %s2143_s3 = inlined_call_operand.vmem [shape: f32[1,32], index: 3, kind: input, shape index: {}]   ;;  %s2144_s4 = inlined_call_operand.vmem [shape: f32[1,32], index: 4, kind: input, shape index: {}]   ;;  %s2145_s5 = inlined_call_operand.vmem [shape: f32[1,32], index: 5, kind: input, shape index: {}]   ;;  %s2146_s6 = inlined_call_operand.vmem [shape: f32[4,32,8], index: 6, kind: input, shape index: {}]   ;;  %s2147_s7 = inlined_call_operand.vmem [shape: f32[4,1,8], index: 7, kind: input, shape index: {}]   ;;  %s2148_s8 = inlined_call_operand.vmem [shape: f32[4,32,8], index: 8, kind: input, shape index: {}]   ;;  %s2149_s9 = inlined_call_operand.vmem [shape: f32[4,1,8], index: 9, kind: input, shape index: {}]   ;;  %s2150_s10 = inlined_call_operand.vmem [shape: f32[4,32,8], index: 10, kind: input, shape index: {}]   ;;  %s2151_s11 = inlined_call_operand.vmem [shape: f32[4,1,8], index: 11, kind: input, shape index: {}]   ;;  %s2152_s12 = inlined_call_operand.vmem [shape: f32[4,8,32], index: 12, kind: input, shape index: {}]   ;;  %s2153_s13 = inlined_call_operand.vmem [shape: f32[1,32], index: 13, kind: input, shape index: {}]   ;;  %s2154_s14 = inlined_call_operand.hbm [shape: f32[16,32], index: 14, kind: output, shape index: {}]  }
   0x1   :  { %2158 = sst [smem:[#allocation8_spill]] %s2140_s0 }
   0x2   :  { %2159 = sst [smem:[#allocation9_spill]] %s2141_s1 }
   0x3   :  { %19 = vsyncpa [#allocation3], 0 }
   0x4   :  { %21 = vsyncpa [#allocation3 + $0x1], 0  ;;  %s1740_s29 = smov 0   ;;  %s1742_s30 = smov 0  }
   0x5   :  { %s1744_s15 = smov 0   ;;  %s1746_s16 = smov 0  }
   0x6 LB: > { %2160 = sst [smem:[#allocation5_spill]] %s1658_s15  ;;  %s1761_s17 = sadd.s32 4294967295, %s1662_s16   ;;  %s1662_s16 = sphi %s1746_s16, %s2167_s16   ;;  %s1658_s15 = sphi %s1744_s15, %s2169_s15   ;;  %s1654_s30 = sphi %s1742_s30, %s2171_s30   ;;  %s1650_s29 = sphi %s1740_s29, %s2170_s29  }
   0x7   : > { %s1419_s18 = sadd.s32 4294967294, %s1662_s16   ;;  %s1765_s19 = sadd.s32 1, %s1662_s16  }
   0x8   : > { %2161 = sst [smem:[#allocation6_spill]] %s1765_s19  ;;  %s338_s20 = sadd.s32 1, %s1658_s15 }
   0x9   : > { %s335_s21 = ssub.s32 %s1662_s16, %s1765_s19  ;;  %p348_p0 = scmp.ne.s32.totalorder %s1658_s15, %s1654_s30 }
   0xa   : > { %p336_p1 = scmp.eq.s32.totalorder %s335_s21, 0  ;;  %p349_p2 = scmp.eq.s32.totalorder %s1761_s17, 1 }
   0xb   : > { %p354_p3 = scmp.ne.s32.totalorder %s1654_s30, %s1650_s29  ;;  %p355_p4 = scmp.eq.s32.totalorder %s1419_s18, 1 }
   0xc   : > { %s1776_s22 = scalar_select %p336_p1, %s1658_s15, %s338_s20  }
   0xd   : > { %p1778_p5 = por %p349_p2, %p348_p0  ;;  %p1782_p6 = por %p355_p4, %p354_p3 }
   0xe   : > { %2162 = sst [smem:[#allocation7_spill]] %s1776_s22  ;;  %p1422_p7 = scmp.ge.s32.totalorder %s1662_s16, 1 }
   0xf   : > { %p425_p8 = scmp.lt.s32.totalorder %s1662_s16, 3 }
  0x11   : > { %p426_p9 = pnand %p1422_p7, %p425_p8 }
  0x12   : > { %s1425_s25 = sshll.u32 (!%p426_p9), %s1761_s17, 1  ;;  %p475_p10 = scmp.lt.s32.totalorder (!%p426_p9), %s1761_s17, 1 }
  0x13   : > { %429 = sbr.rel (%p426_p9) target bundleno = 2555 (0x9fb), region = 76  ;;  %p480_p11 = scmp.lt.s32.totalorder (!%p426_p9), %s1425_s25, 3 }
  0x14   : > { %s2165_s0 = sld [smem:[#allocation8_spill]] (!%p426_p9)  ;;  %s1516_s20 = sshll.u32 (!%p426_p9), %s1761_s17, 3 }
  0x15   : > { %s2166_s1 = sld [smem:[#allocation9_spill]] (!%p426_p9) }
  0x18   : > { %s476_s26 = scalar_select %p475_p10, %s1761_s17, 1  ;;  %vm490_vm0 = vcmask 261120   ;;  %v1664_v6 = vmov 32.0   ;;  %v618_v28 = vld [vmem:[%s2148_s8 + $0x18] sm:$0xff]  ;;  %v617_v30 = vld [vmem:[%s2148_s8 + $0x10] sm:$0xff]  ;;  %v616_v32 = vld [vmem:[%s2148_s8 + $0x8] sm:$0xff] }
  0x19   : > { %s2173_s25 = smov (!%p480_p11, %s1425_s25), 3  ;;  %1576 = vrcp.f32 %v1664_v6  ;;  %v655_v29 = vld [vmem:[%s2150_s10 + $0x18] sm:$0xff]  ;;  %641 = vmatpush.msra.mxu1 %v618_v28  ;;  %v654_v31 = vld [vmem:[%s2150_s10 + $0x10] sm:$0xff]  ;;  %v653_v33 = vld [vmem:[%s2150_s10 + $0x8] sm:$0xff]  ;;  %vm683_vm11 = vcmask 64512   ;;  %vm713_vm12 = vcmask 130048  }
  0x1a   : > { %s1424_s27 = sshll.u32 %s476_s26, 3  ;;  %s1426_s28 = sshll.u32 %s2173_s25, 3  ;;  %672 = vmatpush.msra.mxu2 %v655_v29  ;;  %v615_v34 = vld [vmem:[%s2148_s8] sm:$0xff]  ;;  %v587_v39 = vld [vmem:[%s2146_s6 + $0x18] sm:$0xff]  ;;  %v586_v41 = vld [vmem:[%s2146_s6 + $0x10] sm:$0xff] }
  0x1b   : > { %s478_s21 = scalar_lea.vmem %s2165_s0, %s1424_s27  ;;  %s483_s19 = scalar_lea.vmem %s2166_s1, %s1426_s28  ;;  %642 = vmatpush.msra.mxu1 %v617_v30  ;;  %v652_v35 = vld [vmem:[%s2150_s10] sm:$0xff]  ;;  %v1452_v40 = vld [vmem:[%s2150_s10 + $0x38] sm:$0xff]  ;;  %607 = vmatpush.msra.mxu0 %v587_v39  ;;  %v1451_v42 = vld [vmem:[%s2150_s10 + $0x30] sm:$0xff] }
  0x1c   : > { %v485_v0 = vld [vmem:[%s478_s21] sm:$0xff]  ;;  %v487_v4 = vld [vmem:[%s483_s19 + $0x8] sm:$0xff]  ;;  %673 = vmatpush.msra.mxu2 %v654_v31  ;;  %v1498_v28 = vld [vmem:[%s2148_s8 + $0x78] sm:$0xff]  ;;  %s472_s28 = sand.u32 1, %s1654_s30  }
  0x1d   : > { %v486_v1 = vld [vmem:[%s483_s19] sm:$0xff]  ;;  %v491_v2 = vsel %vm490_vm0, %v485_v0, 0.0  ;;  %v533_v5 = vsel %vm490_vm0, %v487_v4, 0.0  ;;  %643 = vmatpush.msra.mxu1 %v616_v32  ;;  %v585_v43 = vld [vmem:[%s2146_s6 + $0x8] sm:$0xff]  ;;  %608 = vmatpush.msra.mxu0 %v586_v41  ;;  %v1439_v39 = vld [vmem:[%s2146_s6 + $0x38] sm:$0xff]  ;;  %s1423_s18 = sshll.u32 %s472_s28, 3  ;;  %s1343_s19 = scalar_lea.hbm %s2154_s14, %s1516_s20 }
  0x1e   : > { %v530_v3 = vsel %vm490_vm0, %v486_v1, 0.0  ;;  %492 = vadd.xlane.f32.xlu1 %v491_v2  ;;  %674 = vmatpush.msra.mxu2 %v653_v33  ;;  %v1450_v45 = vld [vmem:[%s2150_s10 + $0x28] sm:$0xff]  ;;  %v584_v47 = vld [vmem:[%s2146_s6] sm:$0xff]  ;;  %s474_s0 = scalar_lea.vmem [#allocation2], %s1423_s18  ;;  %s1347_s27 = sshll.u32 %s1343_s19, 4  ;;  %s1348_s27 = int_to_ptr.hbm [resolvable:$true] %s1347_s27 }
  0x1f   : > { %531 = vadd.xlane.f32.xlu0 %v530_v3  ;;  %v1577_v7 = vpop.eup %1576  ;;  %644 = vmatpush.msra.mxu1 %v615_v34  ;;  %v1449_v48 = vld [vmem:[%s2150_s10 + $0x20] sm:$0xff]  ;;  %v1496_v29 = vld [vmem:[%s2148_s8 + $0x68] sm:$0xff]  ;;  %s1345_s26 = sshll.u32 %s474_s0, 4  ;;  %s1333_s17 = scalar_lea.sflag [#allocation3], %s472_s28  ;;  %s1346_s26 = int_to_ptr.vmem [resolvable:$true] %s1345_s26 }
  0x20   : > { %v495_v8 = vmul.f32 32.0, %v1577_v7  ;;  %vm499_vm1 = vweird.f32 %v1577_v7  ;;  %675 = vmatpush.msra.mxu2 %v652_v35  ;;  %609 = vmatpush.msra.mxu0 %v585_v43  ;;  %v1559_v61 = vld [vmem:[%s2144_s4] ss:$0 sm:$0xff]  ;;  %s1614_s1 = sshra.s32 %s1348_s27, 4  ;;  %s1620_s18 = scalar_lea.hbm %s2154_s14, 16  ;;  %s1615_s1 = int_to_ptr.hbm [resolvable:$true] %s1614_s1 }
  0x21   : > { %834 = vmatpush.msrb.mxu1 %v1452_v40  ;;  %v1495_v30 = vld [vmem:[%s2148_s8 + $0x60] sm:$0xff]  ;;  %s1616_s21 = scalar_lea.hbm %s1615_s1, 8  ;;  %p1621_p1 = scmp.lt.s32.totalorder %s1615_s1, %s2154_s14 }
  0x22   : > { %v496_v9 = vsub.f32 1.0, %v495_v8  ;;  %610 = vmatpush.msra.mxu0 %v584_v47  ;;  %v1563_v33 = vld [vmem:[%s2149_s9] ss:$0 sm:$0xff]  ;;  %v1437_v47 = vld [vmem:[%s2146_s6 + $0x28] sm:$0xff]  ;;  %p1617_p12 = scmp.ne.s32.totalorder %s1615_s1, %s1616_s21  ;;  %p1622_p2 = scmp.lt.s32.totalorder %s1620_s18, %s1616_s21 }
  0x23   : > { %835 = vmatpush.msrb.mxu1 %v1451_v42  ;;  %v1438_v42 = vld [vmem:[%s2146_s6 + $0x30] sm:$0xff] }
  0x24   : > { %v497_v10 = vmul.f32 %v1577_v7, %v496_v9  ;;  %p1618_p13 = pnand %p1617_p12, %p1778_p5  ;;  %p1623_p3 = por %p1622_p2, %p1621_p1 }
  0x25   : > { %836 = vmatpush.msrb.mxu1 %v1450_v45 }
  0x26   : > { %v498_v11 = vadd.f32 %v1577_v7, %v497_v10  ;;  %v1471_v10 = vld [vmem:[%s2148_s8 + $0x50] sm:$0xff]  ;;  %p1619_p0 = pneg %p1618_p13 }
  0x27   : > { %534 = vadd.xlane.f32.xlu0 %v533_v5  ;;  %837 = vmatpush.msrb.mxu1 %v1449_v48  ;;  %v1436_v48 = vld [vmem:[%s2146_s6 + $0x20] sm:$0xff] }
  0x28   : > { %v1800_v12 = vsel %vm499_vm1, %v1577_v7, %v498_v11  ;;  %v1472_v7 = vld [vmem:[%s2148_s8 + $0x58] sm:$0xff]  ;;  %p1624_p4 = pnand %p1623_p3, %p1619_p0 }
  0x91   : > { %v493_v17 = vpop.xlane.xlu1 %492 }
  0x92   : > { %v532_v13 = vpop.xlane.xlu0 %531  ;;  %v501_v21 = vmul.f32 %v1800_v12, %v493_v17  ;;  %v1469_v17 = vld [vmem:[%s2148_s8 + $0x40] sm:$0xff] }
  0x93   : > { %v536_v14 = vmul.f32 %v532_v13, %v1800_v12 }
  0x94   : > { %v1814_v24 = vsub.f32 %v485_v0, %v501_v21  ;;  %v1560_v0 = vld [vmem:[%s2145_s5] ss:$0 sm:$0xff] }
  0x95   : > { %v1803_v15 = vsub.f32 %v486_v1, %v536_v14  ;;  %v1470_v14 = vld [vmem:[%s2148_s8 + $0x48] sm:$0xff]  ;;  %v1561_v21 = vld [vmem:[%s2142_s2] ss:$0 sm:$0xff] }
  0x96   : > { %v503_v26 = vmul.f32 %v1814_v24, %v1814_v24 }
  0x97   : > { %v540_v16 = vmul.f32 %v1803_v15, %v1803_v15 }
  0x98   : > { %v504_v27 = vsel %vm490_vm0, %v503_v26, 0.0 }
  0x99   : > { %v542_v18 = vsel %vm490_vm0, %v540_v16, 0.0 }
  0x9a   : > { %v535_v19 = vpop.xlane.xlu0 %534  ;;  %543 = vadd.xlane.f32.xlu1 %v542_v18 }
  0x9b   : > { %v537_v20 = vmul.f32 %v535_v19, %v1800_v12 }
  0x9d   : > { %v1810_v22 = vsub.f32 %v487_v4, %v537_v20 }
  0x9f   : > { %v541_v23 = vmul.f32 %v1810_v22, %v1810_v22 }
  0xa1   : > { %v545_v25 = vsel %vm490_vm0, %v541_v23, 0.0 }
  0xa2   : > { %546 = vadd.xlane.f32.xlu2 %v545_v25  ;;  %v1562_v25 = vld [vmem:[%s2143_s3] ss:$0 sm:$0xff] }
  0xaa   : > { %505 = vadd.xlane.f32.xlu2 %v504_v27 }
 0x10d   : > { %v544_v36 = vpop.xlane.xlu1 %543 }
 0x10e   : > { %v548_v37 = vmul.f32 %v544_v36, %v1800_v12 }
 0x110   : > { %v550_v38 = vadd.f32 1e-05, %v548_v37  ;;  %v1564_v37 = vld [vmem:[%s2151_s11] ss:$0 sm:$0xff] }
 0x112   : > { %1578 = vrsqrt.f32 %v550_v38  ;;  %vm558_vm3 = vweird.f32 %v550_v38 }
 0x115   : > { %v547_v44 = vpop.xlane.xlu2 %546 }
 0x116   : > { %v549_v46 = vmul.f32 %v547_v44, %v1800_v12 }
 0x118   : > { %v1579_v49 = vpop.eup %1578  ;;  %v551_v50 = vadd.f32 1e-05, %v549_v46 }
 0x119   : > { %v553_v51 = vmul.f32 %v1579_v49, %v550_v38  ;;  %vm559_vm2 = vweird.f32 %v1579_v49  ;;  %v1565_v38 = vld [vmem:[%s2147_s7] ss:$0 sm:$0xff] }
 0x11a   : > { %1580 = vrsqrt.f32 %v551_v50  ;;  %vm560_vm4 = vmor %vm558_vm3, %vm559_vm2  ;;  %vm568_vm6 = vweird.f32 %v551_v50 }
 0x11b   : > { %v554_v52 = vmul.f32 %v1579_v49, %v553_v51 }
 0x11d   : > { %v555_v53 = vmul.f32 0.5, %v554_v52  ;;  %v506_v54 = vpop.xlane.xlu2 %505 }
 0x11e   : > { %v507_v55 = vmul.f32 %v506_v54, %v1800_v12 }
 0x11f   : > { %v556_v56 = vsub.f32 1.5, %v555_v53 }
 0x120   : > { %v1581_v57 = vpop.eup %1580  ;;  %v508_v58 = vadd.f32 1e-05, %v507_v55 }
 0x121   : > { %v557_v59 = vmul.f32 %v1579_v49, %v556_v56  ;;  %v563_v60 = vmul.f32 %v1581_v57, %v551_v50  ;;  %vm569_vm5 = vweird.f32 %v1581_v57 }
 0x122   : > { %1582 = vrsqrt.f32 %v508_v58  ;;  %vm570_vm7 = vmor %vm568_vm6, %vm569_vm5  ;;  %vm515_vm9 = vweird.f32 %v508_v58 }
 0x123   : > { %v561_v62 = vsel %vm560_vm4, %v1579_v49, %v557_v59  ;;  %v564_v63 = vmul.f32 %v1581_v57, %v563_v60  ;;  %v1566_v49 = vld [vmem:[%s2151_s11 + $0x1] ss:$0 sm:$0xff]  ;;  %v1445_v60 = vld [vmem:[%s2148_s8 + $0x38] sm:$0xff] }
 0x124   : > { %v572_v1 = vmul.f32 %v561_v62, %v1803_v15  ;;  %v1443_v62 = vld [vmem:[%s2148_s8 + $0x28] sm:$0xff] }
 0x125   : > { %v565_v2 = vmul.f32 0.5, %v564_v63  ;;  %v1442_v63 = vld [vmem:[%s2148_s8 + $0x20] sm:$0xff] }
 0x126   : > { %v577_v3 = vmul.f32 %v1559_v61, %v572_v1 }
 0x127   : > { %v566_v4 = vsub.f32 1.5, %v565_v2 }
 0x128   : > { %v1583_v5 = vpop.eup %1582  ;;  %v1878_v6 = vadd.f32 %v1560_v0, %v577_v3  ;;  %v1466_v3 = vld [vmem:[%s2146_s6 + $0x58] sm:$0xff] }
 0x129   : > { %v567_v8 = vmul.f32 %v1581_v57, %v566_v4  ;;  %v510_v9 = vmul.f32 %v1583_v5, %v508_v58  ;;  %vm516_vm8 = vweird.f32 %v1583_v5  ;;  %v1465_v4 = vld [vmem:[%s2146_s6 + $0x50] sm:$0xff] }
 0x12a   : > { %1428 = vmatmul.msk.f32.vlgmr.msra.gmra.mxu1 %vm490_vm0, %v1878_v6  ;;  %1430 = vmatmul.msk.f32.vlgmr.msra.gmra.mxu2 %vm490_vm0, %v1878_v6  ;;  %vm517_vm10 = vmor %vm515_vm9, %vm516_vm8 }
 0x12b   : > { %v571_v11 = vsel %vm570_vm7, %v1581_v57, %v567_v8  ;;  %v511_v12 = vmul.f32 %v1583_v5, %v510_v9  ;;  %1008 = vmatpush.msra.mxu1 %v1472_v7  ;;  %v1463_v7 = vld [vmem:[%s2146_s6 + $0x40] sm:$0xff] }
 0x12c   : > { %v573_v13 = vmul.f32 %v571_v11, %v1810_v22 }
 0x12d   : > { %v512_v15 = vmul.f32 0.5, %v511_v12  ;;  %1009 = vmatpush.msra.mxu1 %v1471_v10  ;;  %v1570_v10 = vld [vmem:[%s2149_s9 + $0x1] ss:$0 sm:$0xff] }
 0x12e   : > { %v578_v16 = vmul.f32 %v1559_v61, %v573_v13  ;;  %v1444_v61 = vld [vmem:[%s2148_s8 + $0x30] sm:$0xff]  ;;  %v1569_v13 = vld [vmem:[%s2147_s7 + $0x1] ss:$0 sm:$0xff] }
 0x12f   : > { %v513_v18 = vsub.f32 1.5, %v512_v15  ;;  %1010 = vmatpush.msra.mxu1 %v1470_v14 }
 0x130   : > { %v1897_v19 = vadd.f32 %v1560_v0, %v578_v16 }
 0x131   : > { %v514_v20 = vmul.f32 %v1583_v5, %v513_v18  ;;  %1011 = vmatpush.msra.mxu1 %v1469_v17 }
 0x132   : > { %1429 = vmatmul.msk.f32.gmra.mxu1 %vm490_vm0, %v1897_v19  ;;  %1431 = vmatmul.msk.f32.gmra.mxu2 %vm490_vm0, %v1897_v19 }
 0x133   : > { %v518_v22 = vsel %vm517_vm10, %v1583_v5, %v514_v20  ;;  %v1464_v5 = vld [vmem:[%s2146_s6 + $0x48] sm:$0xff] }
 0x134   : > { %v519_v23 = vmul.f32 %v518_v22, %v1814_v24  ;;  %v1497_v24 = vld [vmem:[%s2148_s8 + $0x70] sm:$0xff] }
 0x136   : > { %v523_v26 = vmul.f32 %v1561_v21, %v519_v23 }
 0x138   : > { %v1910_v27 = vadd.f32 %v1562_v25, %v523_v26  ;;  %v748_v26 = vld [vmem:[%s2152_s12] sm:$0xff] }
 0x13a   : > { %1427 = vmatmul.msk.f32.vlgmr.msra.gmra.mxu0 %vm490_vm0, %v1910_v27  ;;  %1454 = vmatmul.msk.f32.vlgmr.msrb.gmra.mxu1 %vm490_vm0, %v1878_v6 }
 0x13b   : > { %1193 = vmatpush.msrb.mxu1 %v1498_v28 }
 0x13d   : > { %1194 = vmatpush.msrb.mxu1 %v1497_v24 }
 0x13f   : > { %1195 = vmatpush.msrb.mxu1 %v1496_v29 }
 0x141   : > { %1196 = vmatpush.msrb.mxu1 %v1495_v30 }
 0x142   : > { %1455 = vmatmul.msk.f32.gmra.mxu1 %vm490_vm0, %v1897_v19 }
 0x14a   : > { %1474 = vmatmul.msk.f32.vlgmr.msra.gmra.mxu1 %vm490_vm0, %v1878_v6 }
 0x152   : > { %1475 = vmatmul.msk.f32.gmra.mxu1 %vm490_vm0, %v1897_v19 }
 0x15a   : > { %1500 = vmatmul.msk.f32.vlgmr.msrb.gmra.mxu1 %vm490_vm0, %v1878_v6 }
 0x162   : > { %1501 = vmatmul.msk.f32.gmra.mxu1 %vm490_vm0, %v1897_v19 }
 0x1a7   : > { %v646_v31 = vpop.f32.mrf.mxu1 }
 0x1a8   : > { %v647_v36 = vadd.f32 %v1563_v33, %v646_v31  ;;  %v1567_v31 = vld [vmem:[%s2149_s9 + $0x2] ss:$0 sm:$0xff] }
 0x1ad   : > { %v677_v32 = vpop.f32.mrf.mxu2 }
 0x1ae   : > { %v678_v45 = vadd.f32 %v1564_v37, %v677_v32 }
 0x1af   : > { %v649_v34 = vpop.f32.mrf.mxu1 }
 0x1b0   : > { %v650_v35 = vadd.f32 %v1563_v33, %v649_v34 }
 0x1b2   : > { %1432 = vmatpush.xpose.msk.msra.mxu3 %vm683_vm11, %v650_v35 }
 0x1b5   : > { %v680_v40 = vpop.f32.mrf.mxu2 }
 0x1b6   : > { %v681_v41 = vadd.f32 %v1564_v37, %v680_v40  ;;  %1433 = vmatpush.xpose.msk.msra.mxu3 %vm683_vm11, %v647_v36  ;;  %v1487_v36 = vld [vmem:[%s2152_s12 + $0x10] sm:$0xff]  ;;  %v1571_v37 = vld [vmem:[%s2147_s7 + $0x2] ss:$0 sm:$0xff]  ;;  %v1568_v40 = vld [vmem:[%s2149_s9 + $0x3] ss:$0 sm:$0xff] }
 0x1b7   : > { %v612_v43 = vpop.f32.mrf.mxu0  ;;  %v839_v44 = vpop.f32.mrf.mxu1 }
 0x1b8   : > { %v613_v46 = vadd.f32 %v1565_v38, %v612_v43  ;;  %742 = vmatpush.msrb.mxu0 %v681_v41  ;;  %v840_v52 = vadd.f32 %v1566_v49, %v839_v44  ;;  %v1460_v44 = vld [vmem:[%s2152_s12 + $0x8] sm:$0xff] }
 0x1ba   : > { %771 = vmatpush.msrb.mxu3 %v1439_v39  ;;  %743 = vmatpush.msrb.mxu0 %v678_v45  ;;  %v1479_v45 = vld [vmem:[%s2150_s10 + $0x58] sm:$0xff] }
 0x1bb   : > { %1434 = vmatmul.msk.f32.vlgmr.msra.gmra.mxu3 %vm683_vm11, %v613_v46  ;;  %v1478_v46 = vld [vmem:[%s2150_s10 + $0x50] sm:$0xff] }
 0x1bc   : > { %772 = vmatpush.msrb.mxu3 %v1438_v42  ;;  %801 = vmatpush.msra.mxu0 %v1445_v60 }
 0x1be   : > { %773 = vmatpush.msrb.mxu3 %v1437_v47  ;;  %802 = vmatpush.msra.mxu0 %v1444_v61  ;;  %v1477_v47 = vld [vmem:[%s2150_s10 + $0x48] sm:$0xff] }
 0x1bf   : > { %v842_v50 = vpop.f32.mrf.mxu1 }
 0x1c0   : > { %774 = vmatpush.msrb.mxu3 %v1436_v48  ;;  %v843_v51 = vadd.f32 %v1566_v49, %v842_v50  ;;  %803 = vmatpush.msra.mxu0 %v1443_v62  ;;  %v1476_v48 = vld [vmem:[%s2150_s10 + $0x40] sm:$0xff]  ;;  %v1505_v49 = vld [vmem:[%s2150_s10 + $0x78] sm:$0xff] }
 0x1c2   : > { %902 = vmatpush.msra.mxu3 %v843_v51  ;;  %804 = vmatpush.msra.mxu0 %v1442_v63  ;;  %v1504_v51 = vld [vmem:[%s2150_s10 + $0x70] sm:$0xff] }
 0x1c3   : > { %1441 = vmatmul.msk.f32.vlgmr.msrb.gmra.mxu3 %vm490_vm0, %v1910_v27 }
 0x1c4   : > { %903 = vmatpush.msra.mxu3 %v840_v52  ;;  %v1503_v52 = vld [vmem:[%s2150_s10 + $0x68] sm:$0xff] }
 0x1c6   : > { %951 = vmatpush.msrb.mxu3 %v748_v26 }
 0x1c7   : > { %v1013_v28 = vpop.f32.mrf.mxu1 }
 0x1c8   : > { %v1014_v35 = vadd.f32 %v1567_v31, %v1013_v28 }
 0x1cf   : > { %v1016_v29 = vpop.f32.mrf.mxu1 }
 0x1d0   : > { %v1017_v33 = vadd.f32 %v1567_v31, %v1016_v29 }
 0x1d7   : > { %v1198_v34 = vpop.f32.mrf.mxu1 }
 0x1d8   : > { %v1199_v43 = vadd.f32 %v1568_v40, %v1198_v34 }
 0x1df   : > { %v1201_v39 = vpop.f32.mrf.mxu1 }
 0x1e0   : > { %v1202_v42 = vadd.f32 %v1568_v40, %v1201_v39 }
 0x23e   : > { %v710_v53 = vpop.f32.mrf.mxu3 }
 0x23f   : > { %v714_v54 = vsel %vm713_vm12, %v710_v53, -inf }
 0x240   : > { %715 = vmax.xlane.f32.xlu0 %v714_v54 }
 0x246   : > { %v776_v14 = vpop.f32.mrf.mxu3 }
 0x247   : > { %v777_v16 = vadd.f32 %v1569_v13, %v776_v14 }
 0x2b3   : > { %v716_v55 = vpop.xlane.xlu0 %715 }
 0x2b4   : > { %v717_v56 = vsub.f32 %v710_v53, %v716_v55  ;;  %v1502_v53 = vld [vmem:[%s2150_s10 + $0x60] sm:$0xff] }
 0x2b6   : > { %v718_v57 = vmul.f32 1.442695, %v717_v56 }
 0x2b8   : > { %1584 = vpow2.f32 %v718_v57 }
 0x2be   : > { %v1585_v58 = vpop.eup %1584 }
 0x2bf   : > { %v720_v59 = vsel %vm713_vm12, %v1585_v58, 0.0 }
 0x2c0   : > { %721 = vadd.xlane.f32.xlu1 %v720_v59 }
 0x333   : > { %v722_v0 = vpop.xlane.xlu1 %721 }
 0x334   : > { %1586 = vrcp.f32 %v722_v0  ;;  %v1572_v0 = vld [vmem:[%s2151_s11 + $0x2] ss:$0 sm:$0xff] }
 0x33a   : > { %v1587_v1 = vpop.eup %1586 }
 0x33b   : > { %v724_v2 = vmul.f32 %v1587_v1, %v1585_v58 }
 0x33d   : > { %1435 = vmatmul.msk.f32.vlgmr.msrb.gmra.mxu0 %vm713_vm12, %v724_v2 }
 0x33e   : > { %978 = vmatpush.msrb.mxu0 %v1466_v3  ;;  %v1491_v3 = vld [vmem:[%s2146_s6 + $0x70] sm:$0xff] }
 0x340   : > { %979 = vmatpush.msrb.mxu0 %v1465_v4  ;;  %v1490_v4 = vld [vmem:[%s2146_s6 + $0x68] sm:$0xff] }
 0x342   : > { %980 = vmatpush.msrb.mxu0 %v1464_v5  ;;  %v1489_v5 = vld [vmem:[%s2146_s6 + $0x60] sm:$0xff] }
 0x344   : > { %981 = vmatpush.msrb.mxu0 %v1463_v7 }
 0x345   : > { %1447 = vmatmul.msk.f32.vlgmr.msra.gmra.mxu0 %vm490_vm0, %v1878_v6 }
 0x34d   : > { %1448 = vmatmul.msk.f32.gmra.mxu0 %vm490_vm0, %v1897_v19 }
 0x355   : > { %1468 = vmatmul.msk.f32.vlgmr.msrb.gmra.mxu0 %vm490_vm0, %v1910_v27 }
 0x3ba   : > { %v745_v8 = vpop.f32.mrf.mxu0 }
 0x3c2   : > { %v806_v9 = vpop.f32.mrf.mxu0 }
 0x3c3   : > { %v807_v15 = vadd.f32 %v1570_v10, %v806_v9 }
 0x3ca   : > { %v809_v11 = vpop.f32.mrf.mxu0 }
 0x3cb   : > { %v810_v12 = vadd.f32 %v1570_v10, %v809_v11  ;;  %v1573_v11 = vld [vmem:[%s2151_s11 + $0x3] ss:$0 sm:$0xff] }
 0x3cd   : > { %1456 = vmatpush.xpose.msk.msrb.mxu2 %vm683_vm11, %v810_v12 }
 0x3d1   : > { %1457 = vmatpush.xpose.msk.msrb.mxu2 %vm683_vm11, %v807_v15 }
 0x3d2   : > { %v983_v38 = vpop.f32.mrf.mxu0 }
 0x3d3   : > { %v984_v41 = vadd.f32 %v1571_v37, %v983_v38 }
 0x3d4   : > { %1458 = vmatmul.msk.f32.vlgmr.msrb.gmra.mxu2 %vm683_vm11, %v777_v16  ;;  %v1574_v16 = vld [vmem:[%s2147_s7 + $0x3] ss:$0 sm:$0xff] }
 0x3d5   : > { %928 = vmatpush.msra.mxu2 %v1460_v44 }
 0x3d7   : > { %1041 = vmatpush.msrb.mxu2 %v1479_v45 }
 0x3d9   : > { %1042 = vmatpush.msrb.mxu2 %v1478_v46 }
 0x3db   : > { %1043 = vmatpush.msrb.mxu2 %v1477_v47 }
 0x3dd   : > { %1044 = vmatpush.msrb.mxu2 %v1476_v48 }
 0x457   : > { %v871_v17 = vpop.f32.mrf.mxu2 }
 0x458   : > { %v874_v18 = vsel %vm713_vm12, %v871_v17, -inf }
 0x459   : > { %875 = vmax.xlane.f32.xlu2 %v874_v18 }
 0x4cc   : > { %v876_v20 = vpop.xlane.xlu2 %875 }
 0x4cd   : > { %v877_v21 = vsub.f32 %v871_v17, %v876_v20 }
 0x4cf   : > { %v878_v22 = vmul.f32 1.442695, %v877_v21 }
 0x4d1   : > { %1588 = vpow2.f32 %v878_v22 }
 0x4d7   : > { %v1589_v23 = vpop.eup %1588 }
 0x4d8   : > { %v880_v25 = vsel %vm713_vm12, %v1589_v23, 0.0 }
 0x4d9   : > { %881 = vadd.xlane.f32.xlu0 %v880_v25 }
 0x54c   : > { %v882_v24 = vpop.xlane.xlu0 %881 }
 0x54d   : > { %1590 = vrcp.f32 %v882_v24 }
 0x553   : > { %v1591_v30 = vpop.eup %1590 }
 0x554   : > { %v884_v32 = vmul.f32 %v1591_v30, %v1589_v23 }
 0x556   : > { %1459 = vmatmul.msk.f32.vlgmr.msra.gmra.mxu3 %vm713_vm12, %v884_v32 }
 0x557   : > { %1483 = vmatpush.xpose.msk.msra.mxu3 %vm683_vm11, %v1017_v33  ;;  %v1513_v33 = vld [vmem:[%s2152_s12 + $0x18] sm:$0xff] }
 0x55b   : > { %1484 = vmatpush.xpose.msk.msra.mxu3 %vm683_vm11, %v1014_v35  ;;  %v1575_v35 = vld [vmem:[%s2153_s13] ss:$0 sm:$0xff] }
 0x55e   : > { %1462 = vmatmul.msk.f32.vlgmr.msrb.gmra.mxu3 %vm683_vm11, %v745_v8 }
 0x55f   : > { %1135 = vmatpush.msrb.mxu3 %v1487_v36 }
 0x566   : > { %1485 = vmatmul.msk.f32.vlgmr.msra.gmra.mxu3 %vm683_vm11, %v984_v41 }
 0x567   : > { %1509 = vmatpush.xpose.msk.msra.mxu3 %vm683_vm11, %v1202_v42 }
 0x56b   : > { %1510 = vmatpush.xpose.msk.msra.mxu3 %vm683_vm11, %v1199_v43 }
 0x5d9   : > { %v905_v50 = vpop.f32.mrf.mxu3 }
 0x5da   : > { %1461 = vmatmul.msk.f32.vlgmr.msra.gmra.mxu2 %vm683_vm11, %v905_v50 }
 0x5db   : > { %1226 = vmatpush.msra.mxu2 %v1505_v49 }
 0x5dd   : > { %1227 = vmatpush.msra.mxu2 %v1504_v51 }
 0x5df   : > { %1228 = vmatpush.msra.mxu2 %v1503_v52 }
 0x5e1   : > { %v953_v54 = vpop.f32.mrf.mxu3  ;;  %1229 = vmatpush.msra.mxu2 %v1502_v53 }
 0x5e2   : > { %1481 = vmatmul.msk.f32.vlgmr.msrb.gmra.mxu2 %vm490_vm0, %v1878_v6 }
 0x5e9   : > { %v1078_v55 = vpop.f32.mrf.mxu3 }
 0x5ea   : > { %1482 = vmatmul.msk.f32.gmra.mxu2 %vm490_vm0, %v1897_v19  ;;  %v1081_v56 = vsel %vm713_vm12, %v1078_v55, -inf }
 0x5eb   : > { %1082 = vmax.xlane.f32.xlu1 %v1081_v56 }
 0x5f2   : > { %1507 = vmatmul.msk.f32.vlgmr.msra.gmra.mxu2 %vm490_vm0, %v1878_v6 }
 0x5fa   : > { %1508 = vmatmul.msk.f32.gmra.mxu2 %vm490_vm0, %v1897_v19  ;;  %v1492_v19 = vld [vmem:[%s2146_s6 + $0x78] sm:$0xff] }
 0x65d   : > { %v930_v57 = vpop.f32.mrf.mxu2 }
 0x65e   : > { %v1083_v58 = vpop.xlane.xlu1 %1082  ;;  %v954_v20 = vadd.f32 %v953_v54, %v930_v57 }
 0x65f   : > { %v1084_v59 = vsub.f32 %v1078_v55, %v1083_v58 }
 0x661   : > { %v1085_v60 = vmul.f32 1.442695, %v1084_v59 }
 0x663   : > { %1592 = vpow2.f32 %v1085_v60 }
 0x665   : > { %v1046_v61 = vpop.f32.mrf.mxu2 }
 0x666   : > { %v1047_v6 = vadd.f32 %v1572_v0, %v1046_v61 }
 0x669   : > { %v1593_v62 = vpop.eup %1592 }
 0x66a   : > { %v1087_v63 = vsel %vm713_vm12, %v1593_v62, 0.0 }
 0x66b   : > { %1088 = vadd.xlane.f32.xlu2 %v1087_v63 }
 0x66d   : > { %v1049_v1 = vpop.f32.mrf.mxu2 }
 0x66e   : > { %v1050_v2 = vadd.f32 %v1572_v0, %v1049_v1 }
 0x670   : > { %1109 = vmatpush.msra.mxu0 %v1050_v2 }
 0x672   : > { %1110 = vmatpush.msra.mxu0 %v1047_v6 }
 0x674   : > { %1163 = vmatpush.msrb.mxu0 %v1492_v19 }
 0x675   : > { %v1231_v7 = vpop.f32.mrf.mxu2 }
 0x676   : > { %1164 = vmatpush.msrb.mxu0 %v1491_v3  ;;  %v1232_v14 = vadd.f32 %v1573_v11, %v1231_v7 }
 0x678   : > { %1165 = vmatpush.msrb.mxu0 %v1490_v4 }
 0x67a   : > { %1166 = vmatpush.msrb.mxu0 %v1489_v5 }
 0x67d   : > { %v1234_v9 = vpop.f32.mrf.mxu2 }
 0x67e   : > { %v1235_v13 = vadd.f32 %v1573_v11, %v1234_v9 }
 0x6de   : > { %v1089_v8 = vpop.xlane.xlu2 %1088 }
 0x6df   : > { %1594 = vrcp.f32 %v1089_v8 }
 0x6e5   : > { %v1595_v10 = vpop.eup %1594 }
 0x6e6   : > { %v1091_v12 = vmul.f32 %v1595_v10, %v1593_v62 }
 0x6e8   : > { %1486 = vmatmul.msk.f32.vlgmr.msra.gmra.mxu0 %vm713_vm12, %v1091_v12 }
 0x6e9   : > { %1294 = vmatpush.msra.mxu0 %v1235_v13 }
 0x6eb   : > { %1295 = vmatpush.msra.mxu0 %v1232_v14 }
 0x6f0   : > { %1494 = vmatmul.msk.f32.vlgmr.msrb.gmra.mxu0 %vm490_vm0, %v1910_v27 }
 0x765   : > { %v1112_v15 = vpop.f32.mrf.mxu0 }
 0x766   : > { %1488 = vmatmul.msk.f32.vlgmr.msrb.gmra.mxu3 %vm683_vm11, %v1112_v15 }
 0x767   : > { %1320 = vmatpush.msrb.mxu3 %v1513_v33 }
 0x76d   : > { %v1168_v17 = vpop.f32.mrf.mxu0 }
 0x76e   : > { %v1169_v18 = vadd.f32 %v1574_v16, %v1168_v17 }
 0x770   : > { %1511 = vmatmul.msk.f32.vlgmr.msra.gmra.mxu3 %vm683_vm11, %v1169_v18 }
 0x7e9   : > { %v1137_v21 = vpop.f32.mrf.mxu3 }
 0x7ea   : > { %v1140_v22 = vadd.f32 %v1137_v21, %v954_v20 }
 0x7f3   : > { %v1263_v23 = vpop.f32.mrf.mxu3 }
 0x7f4   : > { %v1266_v25 = vsel %vm713_vm12, %v1263_v23, -inf }
 0x7f5   : > { %1267 = vmax.xlane.f32.xlu0 %v1266_v25 }
 0x868   : > { %v1268_v26 = vpop.xlane.xlu0 %1267 }
 0x869   : > { %v1269_v27 = vsub.f32 %v1263_v23, %v1268_v26 }
 0x86b   : > { %v1270_v28 = vmul.f32 1.442695, %v1269_v27 }
 0x86d   : > { %1596 = vpow2.f32 %v1270_v28 }
 0x873   : > { %v1597_v24 = vpop.eup %1596 }
 0x874   : > { %v1272_v29 = vsel %vm713_vm12, %v1597_v24, 0.0 }
 0x875   : > { %1273 = vadd.xlane.f32.xlu1 %v1272_v29 }
 0x8e8   : > { %v1274_v30 = vpop.xlane.xlu1 %1273 }
 0x8e9   : > { %1598 = vrcp.f32 %v1274_v30 }
 0x8ef   : > { %v1599_v31 = vpop.eup %1598 }
 0x8f0   : > { %v1276_v32 = vmul.f32 %v1599_v31, %v1597_v24 }
 0x8f2   : > { %1512 = vmatmul.msk.f32.vlgmr.msra.gmra.mxu0 %vm713_vm12, %v1276_v32 }
 0x96f   : > { %v1297_v34 = vpop.f32.mrf.mxu0 }
 0x970   : > { %1514 = vmatmul.msk.f32.vlgmr.msrb.gmra.mxu3 %vm683_vm11, %v1297_v34 }
 0x9f3   : > { %v1322_v36 = vpop.f32.mrf.mxu3 }
 0x9f4   : > { %v1325_v37 = vadd.f32 %v1322_v36, %v1140_v22 }
 0x9f6   : > { %v1330_v38 = vadd.f32 %v1575_v35, %v1325_v37 }
 0x9f8   : > { %1331 = vst.msk [vmem:[%s474_s0] sm:$0xff] %vm490_vm0, %v1330_v38 }
 0x9f9   : > { %1627 = shalt.err (!%p1624_p4)
}
 0x9fa   : > { %1519 = dma.vmem_to_hbm [thread:$0]  (%p1778_p5), %s1346_s26, 128, %s1348_s27, %s1333_s17  }
 0x9fb PF: > { %p1525_p7 = scmp.ge.s32.totalorder %s1662_s16, 2  ;;  %s1359_s0 = sand.u32 1, %s1650_s29  }
 0x9fc   : > { %s1360_s28 = scalar_lea.sflag [#allocation3], %s1359_s0 }
 0x9fd   : > { %p1522_p8 = pnand %p1525_p7, %p1782_p6 }
 0x9ff   : > { %p1523_p9 = pneg %p1522_p8 }
 0xa01   : > { %1645 = dma.done.wait (%p1523_p9), %s1360_s28, 128  }
 0xa02   : > { %1647 = vsyncadd (%p1523_p9), %s1360_s28, 4294967168  ;;  %s2167_s16 = sld [smem:[#allocation6_spill]]  ;;  %s2170_s29 = smov %s1654_s30 }
 0xa03   : > { %s2168_s1 = sld [smem:[#allocation5_spill]] }
 0xa04   : > { %s2169_s15 = sld [smem:[#allocation7_spill]] }
 0xa08   : > { %p24_p10 = scmp.ge.s32.totalorder %s2167_s16, 4  }
 0xa09   : > { %s2171_s30 = smov %s2168_s1 }
 0xa0a   :  { %26 = sbr.rel (!%p24_p10) target bundleno = 6 (0x6), region = 135 }
 0xa0f   :  { %1366 = vsyncpa [#allocation3], 1 }
 0xa10   :  { %1368 = vsyncpa [#allocation3 + $0x1], 1 }

</bundles_post_ra>
